<compile_context>
chip_gen: v5e
topology: v5e:2x2
jax: 0.10.0
libtpu: 0.0.40
codegen_flags: <defaults>
</compile_context>

<pallas_src>
import functools

import jax
import jax.numpy as jnp
import numpy as np
from jax.experimental import pallas as pl
from jax.experimental.pallas import tpu as pltpu

D_MODEL = 128
N_HEADS = 8
D_QKV = D_MODEL // N_HEADS  # 16 (standard choice; the module does not pin it)
DROPOUT_P = 0.1


def _attn_kernel(x_ref, wT_ref, *rest, d_qkv, has_dropout):
    """One grid step: a (Bt, S, D) slab of the batch.

    x_ref   : (Bt, S, D)      float32
    wT_ref  : (D, 3*dh)       bfloat16  (pre-transposed, pre-cast Linear weight)
    mask_ref: (Bt, S, S)      float32   pre-scaled dropout mask (only if has_dropout)
    o_ref   : (Bt, S, dh)     float32
    """
    if has_dropout:
        mask_ref, o_ref = rest
    else:
        (o_ref,) = rest

    Bt, S, D = x_ref.shape
    dh = wT_ref.shape[-1] // 3
    s = d_qkv ** (-0.5)

    # qkv projection: one MXU matmul over all Bt*S rows (bf16 operands, f32 accumulation)
    x2d = x_ref[...].reshape(Bt * S, D).astype(jnp.bfloat16)
    qkv = jnp.dot(x2d, wT_ref[...], preferred_element_type=jnp.float32)  # (Bt*S, 3*dh)

    # Fold scalings: `q *= s` and `scores * s` collapse into q*(s*s); `v *= s` stays on
    # the small (Bt*S, dh) tensor. Nothing elementwise is spent on the (S,S) scores.
    q = (qkv[:, 0 * dh:1 * dh] * (s * s)).reshape(Bt, S, dh).astype(jnp.bfloat16)
    k = qkv[:, 1 * dh:2 * dh].reshape(Bt, S, dh).astype(jnp.bfloat16)
    v = (qkv[:, 2 * dh:3 * dh] * s).reshape(Bt, S, dh).astype(jnp.bfloat16)

    # attention scores + numerically-stable softmax (f32 math)
    scores = jnp.einsum("bqd,bkd->bqk", q, k, preferred_element_type=jnp.float32)
    scores = scores - jnp.max(scores, axis=-1, keepdims=True)
    e = jnp.exp(scores)
    probs = e * pl.reciprocal(jnp.sum(e, axis=-1, keepdims=True), approx=True)

    if has_dropout:
        probs = probs * mask_ref[...]  # mask already holds {0, 1/(1-p)}

    out = jnp.einsum("bqk,bkd->bqd", probs.astype(jnp.bfloat16), v,
                     preferred_element_type=jnp.float32)
    o_ref[...] = out.astype(o_ref.dtype)


def _pick_batch_tile(batch, seq):
    """Largest divisor of `batch` whose packed row count reaches ~256 MXU rows per grid
    step (if possible) while keeping per-step VMEM bounded."""
    best = 1
    for d in range(1, batch + 1):
        if batch % d:
            continue
        if d * seq > 2048:
            break
        best = d
        if d * seq >= 256:
            break
    return best


def model_forward(x, wT_bf16, *, d_qkv=D_QKV, dropout_p=DROPOUT_P, dropout_key=None):
    """x: (B, S, d_model) float32.
    wT_bf16: (d_model, 3*d_qkv*n_heads) bfloat16 — the Linear weight pre-transposed and
    pre-cast once outside the kernel (avoids a per-call transpose and halves weight DMA).
    """
    B, S, D = x.shape
    dh3 = wT_bf16.shape[-1]
    dh = dh3 // 3
    Bt = _pick_batch_tile(B, S)

    has_dropout = dropout_p > 0.0
    operands = [x, wT_bf16]
    in_specs = [
        pl.BlockSpec((Bt, S, D), lambda b: (b, 0, 0)),   # x slab for this batch tile
        pl.BlockSpec((D, dh3), lambda b: (0, 0)),        # full (resident) bf16 weight
    ]
    if has_dropout:
        if dropout_key is None:
            raise ValueError("dropout_key is required when dropout_p > 0")
        keep = jax.random.bernoulli(dropout_key, 1.0 - dropout_p, (B, S, S))
        mask = keep.astype(jnp.float32) * (1.0 / (1.0 - dropout_p))
        operands.append(mask)
        in_specs.append(pl.BlockSpec((Bt, S, S), lambda b: (b, 0, 0)))

    kernel = functools.partial(_attn_kernel, d_qkv=d_qkv, has_dropout=has_dropout)
    return pl.pallas_call(
        kernel,
        out_shape=jax.ShapeDtypeStruct((B, S, dh), x.dtype),
        grid=(B // Bt,),
        in_specs=in_specs,
        out_specs=pl.BlockSpec((Bt, S, dh), lambda b: (b, 0, 0)),
        compiler_params=pltpu.CompilerParams(
            dimension_semantics=("parallel",),        # batch tiles are independent (v7x megacore)
            vmem_limit_bytes=32 * 1024 * 1024,
        ),
    )(*operands)


def ref_forward_no_dropout(x, w_qkv, d_qkv=D_QKV):
    """Pure-JAX f32 reference of the PyTorch forward with dropout disabled."""
    qkv = jnp.einsum("bsd,ed->bse", x, w_qkv)
    q, k, v = jnp.split(qkv, 3, axis=-1)
    s = d_qkv ** (-0.5)
    q = q * s
    v = v * s
    scores = jnp.einsum("bqd,bkd->bqk", q, k) * s
    p = jax.nn.softmax(scores, axis=-1)
    return jnp.einsum("bqk,bkd->bqd", p, v)


if __name__ == "__main__":
    key = jax.random.PRNGKey(0)
    kx, kw, kd = jax.random.split(key, 3)

    B, S = 1, 4  # matches the spec's x = torch.randn(1, 4, 128)
    x = jax.random.normal(kx, (B, S, D_MODEL), dtype=jnp.float32)
    # Deterministic Linear weight, PyTorch layout (out_features, in_features)
    w_qkv = jax.random.normal(kw, (3 * D_QKV * N_HEADS, D_MODEL), dtype=jnp.float32) * (
        1.0 / np.sqrt(D_MODEL)
    )
    # Pre-transpose + pre-cast the weight once, outside the per-call path.
    wT_bf16 = jnp.transpose(w_qkv).astype(jnp.bfloat16)

    # Correctness of the deterministic path (dropout off) vs the f32 reference.
    # Tolerance loosened because the kernel uses bf16 MXU operands (f32 accumulation).
    out_nodrop = model_forward(x, wT_bf16, dropout_p=0.0)
    jax.block_until_ready(out_nodrop)
    ref = ref_forward_no_dropout(x, w_qkv)
    np.testing.assert_allclose(np.asarray(out_nodrop), np.asarray(ref), rtol=5e-2, atol=2e-2)

    # Full forward with training-mode dropout (p = 0.1), as in the PyTorch module.
    out = model_forward(x, wT_bf16, dropout_p=DROPOUT_P, dropout_key=kd)
    jax.block_until_ready(out)
    assert out.shape == (B, S, D_QKV * N_HEADS)
    assert bool(jnp.all(jnp.isfinite(out)))

    print("KERNEL_OK")
</pallas_src>

<mosaic_0001>
module attributes {stable_mosaic.version = 11 : i64} {
  func.func @_attn_kernel(%arg0: i32, %arg1: memref<1x4x128xf32, #tpu.memory_space<vmem>>, %arg2: memref<128x384xbf16, #tpu.memory_space<vmem>>, %arg3: memref<1x4x128xf32, #tpu.memory_space<vmem>>) attributes {dimension_semantics = [#tpu.dimension_semantics<parallel>], iteration_bounds = array<i64: 1>, scalar_prefetch = 0 : i64, scratch_operands = 0 : i64, tpu.core_type = #tpu.core_type<tc>, window_params = [{transform_indices = @transform_0, window_bounds = array<i64: 1, 4, 128>}, {pipeline_mode = #tpu.pipeline_mode<synchronous>, transform_indices = @transform_1, window_bounds = array<i64: 128, 384>}, {transform_indices = @transform_2, window_bounds = array<i64: 1, 4, 128>}]} {
    %c0 = arith.constant 0 : index
    %c0_0 = arith.constant 0 : index
    %c0_1 = arith.constant 0 : index
    %0 = vector.load %arg1[%c0, %c0_0, %c0_1] : memref<1x4x128xf32, #tpu.memory_space<vmem>>, vector<1x4x128xf32>
    %1 = vector.shape_cast %0 : vector<1x4x128xf32> to vector<4x128xf32>
    %2 = arith.truncf %1 : vector<4x128xf32> to vector<4x128xbf16>
    %c0_2 = arith.constant 0 : index
    %c0_3 = arith.constant 0 : index
    %3 = vector.load %arg2[%c0_2, %c0_3] : memref<128x384xbf16, #tpu.memory_space<vmem>>, vector<128x384xbf16>
    %cst = arith.constant dense<0.000000e+00> : vector<4x384xf32>
    %4 = tpu.matmul %2, %3, %cst {dimension_numbers = #tpu.dot_dimension_numbers<[1], [0], [0], [1], [0, 0, 1, 1], [], []>} : vector<4x128xbf16>, vector<128x384xbf16>, vector<4x384xf32> -> vector<4x384xf32>
    %5 = vector.extract_strided_slice %4 {offsets = [0, 0], sizes = [4, 128], strides = [1, 1]} : vector<4x384xf32> to vector<4x128xf32>
    %cst_4 = arith.constant 6.250000e-02 : f32
    %6 = vector.broadcast %cst_4 : f32 to vector<4x128xf32>
    %7 = arith.mulf %5, %6 : vector<4x128xf32>
    %8 = vector.shape_cast %7 : vector<4x128xf32> to vector<1x4x128xf32>
    %9 = arith.truncf %8 : vector<1x4x128xf32> to vector<1x4x128xbf16>
    %10 = vector.extract_strided_slice %4 {offsets = [0, 128], sizes = [4, 128], strides = [1, 1]} : vector<4x384xf32> to vector<4x128xf32>
    %11 = vector.shape_cast %10 : vector<4x128xf32> to vector<1x4x128xf32>
    %12 = arith.truncf %11 : vector<1x4x128xf32> to vector<1x4x128xbf16>
    %13 = vector.extract_strided_slice %4 {offsets = [0, 256], sizes = [4, 128], strides = [1, 1]} : vector<4x384xf32> to vector<4x128xf32>
    %cst_5 = arith.constant 2.500000e-01 : f32
    %14 = vector.broadcast %cst_5 : f32 to vector<4x128xf32>
    %15 = arith.mulf %13, %14 : vector<4x128xf32>
    %16 = vector.shape_cast %15 : vector<4x128xf32> to vector<1x4x128xf32>
    %17 = arith.truncf %16 : vector<1x4x128xf32> to vector<1x4x128xbf16>
    "tpu.trace_start"() <{level = 10 : i32, message = "bqd,bkd->bqk"}> : () -> ()
    %cst_6 = arith.constant dense<0.000000e+00> : vector<1x4x4xf32>
    %18 = tpu.matmul %9, %12, %cst_6 {dimension_numbers = #tpu.dot_dimension_numbers<[2], [2], [1], [1], [0, 0, 0, 1, 1, 1], [0], [0]>} : vector<1x4x128xbf16>, vector<1x4x128xbf16>, vector<1x4x4xf32> -> vector<1x4x4xf32>
    "tpu.trace_stop"() : () -> ()
    %cst_7 = arith.constant dense<0xFF800000> : vector<1x4xf32>
    %19 = vector.multi_reduction <maximumf>, %18, %cst_7 [2] : vector<1x4x4xf32> to vector<1x4xf32>
    %20 = vector.shape_cast %19 : vector<1x4xf32> to vector<1x4x1xf32>
    %21 = vector.broadcast %20 : vector<1x4x1xf32> to vector<1x4x4xf32>
    %22 = arith.subf %18, %21 : vector<1x4x4xf32>
    %23 = math.exp %22 : vector<1x4x4xf32>
    %cst_8 = arith.constant dense<0.000000e+00> : vector<1x4xf32>
    %24 = vector.multi_reduction <add>, %23, %cst_8 [2] : vector<1x4x4xf32> to vector<1x4xf32>
    %25 = vector.shape_cast %24 : vector<1x4xf32> to vector<1x4x1xf32>
    %26 = tpu.reciprocal %25 {approx = true} : vector<1x4x1xf32> -> vector<1x4x1xf32>
    %27 = vector.broadcast %26 : vector<1x4x1xf32> to vector<1x4x4xf32>
    %28 = arith.mulf %23, %27 : vector<1x4x4xf32>
    %29 = arith.truncf %28 : vector<1x4x4xf32> to vector<1x4x4xbf16>
    "tpu.trace_start"() <{level = 10 : i32, message = "bqk,bkd->bqd"}> : () -> ()
    %cst_9 = arith.constant dense<0.000000e+00> : vector<1x4x128xf32>
    %30 = tpu.matmul %29, %17, %cst_9 {dimension_numbers = #tpu.dot_dimension_numbers<[2], [1], [1], [2], [0, 0, 0, 1, 1, 2], [0], [0]>} : vector<1x4x4xbf16>, vector<1x4x128xbf16>, vector<1x4x128xf32> -> vector<1x4x128xf32>
    "tpu.trace_stop"() : () -> ()
    %c0_10 = arith.constant 0 : index
    %c0_11 = arith.constant 0 : index
    %c0_12 = arith.constant 0 : index
    %31 = vector.load %arg3[%c0_10, %c0_11, %c0_12] : memref<1x4x128xf32, #tpu.memory_space<vmem>>, vector<1x4x128xf32>
    tpu.vector_store %arg3[%c0_10, %c0_11, %c0_12], %30 {strides = array<i32>} : memref<1x4x128xf32, #tpu.memory_space<vmem>>, vector<1x4x128xf32>,
    return
  }
  func.func @transform_0(%arg0: i32) -> (i32, i32, i32) {
    %c0_i32 = arith.constant 0 : i32
    %c0_i32_0 = arith.constant 0 : i32
    %c0_i32_1 = arith.constant 0 : i32
    return %arg0, %c0_i32, %c0_i32_0 : i32, i32, i32
  }
  func.func @transform_1(%arg0: i32) -> (i32, i32) {
    %c0_i32 = arith.constant 0 : i32
    %c0_i32_0 = arith.constant 0 : i32
    %c0_i32_1 = arith.constant 0 : i32
    return %c0_i32, %c0_i32_0 : i32, i32
  }
  func.func @transform_2(%arg0: i32) -> (i32, i32, i32) {
    %c0_i32 = arith.constant 0 : i32
    %c0_i32_0 = arith.constant 0 : i32
    %c0_i32_1 = arith.constant 0 : i32
    return %arg0, %c0_i32, %c0_i32_0 : i32, i32, i32
  }
}

</mosaic_0001>

<bundles_post_ra>
// kernel: tpu_custom_call.1
= control target key start
LH: loop header
LB: loop body
LE: loop exit
PB: predicated region body
PF: predicated region fallthrough
CT: control target
= control target key end

     0   :  { %7 = vsyncpa [#allocation3], 0  ;;  %s554_s0 = inlined_call_operand.hbm [shape: f32[1,4,128], index: 0, kind: input, shape index: {}]   ;;  %s555_s1 = inlined_call_operand.hbm [shape: bf16[128,384], index: 1, kind: input, shape index: {}]   ;;  %s556_s2 = inlined_call_operand.hbm [shape: f32[1,4,128], index: 2, kind: output, shape index: {}]  }
   0x1   :  { %8 = vsyncpa [#allocation6], 0 }
   0x2   :  { %9 = vsyncpa [#allocation4], 0  ;;  %s15_s11 = sshll.u32 %s554_s0, 4  ;;  %s523_s12 = smov [#allocation2]   ;;  %s16_s11 = int_to_ptr.hbm [resolvable:$true] %s15_s11 }
   0x3   :  { %s17_s13 = sshll.u32 %s523_s12, 4  ;;  %s25_s16 = sshll.u32 %s555_s1, 4  ;;  %s18_s13 = int_to_ptr.vmem [resolvable:$true] %s17_s13  ;;  %s26_s16 = int_to_ptr.hbm [resolvable:$true] %s25_s16 }
   0x4   :  { %20 = dma.hbm_to_vmem [thread:$0]  %s16_s11, 64, %s18_s13, [#allocation3]  }
   0x5   :  { %s524_s17 = smov [#allocation5]   ;;  %s525_s19 = smov 192  }
   0x6   :  { %s27_s18 = sshll.u32 %s524_s17, 4  ;;  %s526_s20 = smov 12   ;;  %s28_s18 = int_to_ptr.vmem [resolvable:$true] %s27_s18 }
   0x7   :  { %33 = dma.hbm_to_vmem [thread:$0]  %s26_s16, 3072, %s28_s18, [#allocation6], %s525_s19, %s525_s19, %s526_s20  }
   0x8   :  { %517 = dma.done.wait [#allocation3], 64  }
   0x9   :  { %518 = vsyncadd [#allocation3], 4294967232 }
   0xa   :  { %519 = dma.done.wait [#allocation6], 3072  }
   0xb   :  { %520 = vsyncadd [#allocation6], 4294964224  ;;  %v401_v0 = vld [vmem:[#allocation5 + $0xa8] sm:$0xf]  ;;  %v434_v1 = vld [vmem:[#allocation5 + $0xb0] sm:$0xf0] }
   0xc   :  { %v433_v2 = vld [vmem:[#allocation5 + $0xac] sm:$0xf]  ;;  %v402_v3 = vor.u32 %v434_v1, %v401_v0  ;;  %v403_v4 = vld [vmem:[#allocation5 + $0xb4] sm:$0xf0]  ;;  %v389_v5 = vld [vmem:[#allocation5 + $0x90] sm:$0xf] }
   0xd   :  { %v431_v6 = vld [vmem:[#allocation5 + $0x98] sm:$0xf0]  ;;  %v406_v7 = vor.u32 %v433_v2, %v403_v4  ;;  %v430_v8 = vld [vmem:[#allocation5 + $0x94] sm:$0xf]  ;;  %v391_v9 = vld [vmem:[#allocation5 + $0x9c] sm:$0xf0] }
   0xe   :  { %205 = vmatpush.bf16.msra.mxu0 %v402_v3  ;;  %v390_v10 = vor.u32 %v431_v6, %v389_v5  ;;  %v394_v11 = vor.u32 %v430_v8, %v391_v9  ;;  %v377_v12 = vld [vmem:[#allocation5 + $0x78] sm:$0xf]  ;;  %v428_v13 = vld [vmem:[#allocation5 + $0x80] sm:$0xf0]  ;;  %v427_v14 = vld [vmem:[#allocation5 + $0x7c] sm:$0xf] }
   0xf   :  { %218 = vmatpush.bf16.msra.mxu1 %v406_v7  ;;  %v379_v15 = vld [vmem:[#allocation5 + $0x84] sm:$0xf0]  ;;  %v378_v16 = vor.u32 %v428_v13, %v377_v12  ;;  %v365_v18 = vld [vmem:[#allocation5 + $0x60] sm:$0xf]  ;;  %v425_v19 = vld [vmem:[#allocation5 + $0x68] sm:$0xf0] }
  0x10   :  { %v382_v17 = vor.u32 %v427_v14, %v379_v15  ;;  %v424_v20 = vld [vmem:[#allocation5 + $0x64] sm:$0xf]  ;;  %v367_v21 = vld [vmem:[#allocation5 + $0x6c] sm:$0xf0]  ;;  %v366_v22 = vor.u32 %v425_v19, %v365_v18  ;;  %v353_v24 = vld [vmem:[#allocation5 + $0x48] sm:$0xf] }
  0x11   :  { %v370_v23 = vor.u32 %v424_v20, %v367_v21  ;;  %v422_v25 = vld [vmem:[#allocation5 + $0x50] sm:$0xf0]  ;;  %v421_v26 = vld [vmem:[#allocation5 + $0x4c] sm:$0xf]  ;;  %v355_v27 = vld [vmem:[#allocation5 + $0x54] sm:$0xf0] }
  0x12   :  { %206 = vmatpush.bf16.msra.mxu0 %v390_v10  ;;  %v354_v28 = vor.u32 %v422_v25, %v353_v24  ;;  %v358_v29 = vor.u32 %v421_v26, %v355_v27  ;;  %v341_v30 = vld [vmem:[#allocation5 + $0x30] sm:$0xf]  ;;  %v419_v31 = vld [vmem:[#allocation5 + $0x38] sm:$0xf0]  ;;  %v418_v32 = vld [vmem:[#allocation5 + $0x34] sm:$0xf] }
  0x13   :  { %219 = vmatpush.bf16.msra.mxu1 %v394_v11  ;;  %v343_v33 = vld [vmem:[#allocation5 + $0x3c] sm:$0xf0]  ;;  %v342_v34 = vor.u32 %v419_v31, %v341_v30  ;;  %v329_v36 = vld [vmem:[#allocation5 + $0x18] sm:$0xf]  ;;  %v416_v37 = vld [vmem:[#allocation5 + $0x20] sm:$0xf0] }
  0x14   :  { %v346_v35 = vor.u32 %v418_v32, %v343_v33  ;;  %v415_v38 = vld [vmem:[#allocation5 + $0x1c] sm:$0xf]  ;;  %v331_v39 = vld [vmem:[#allocation5 + $0x24] sm:$0xf0]  ;;  %v330_v40 = vor.u32 %v416_v37, %v329_v36  ;;  %v317_v42 = vld [vmem:[#allocation5] sm:$0xf] }
  0x15   :  { %v334_v41 = vor.u32 %v415_v38, %v331_v39  ;;  %v413_v43 = vld [vmem:[#allocation5 + $0x8] sm:$0xf0]  ;;  %v412_v44 = vld [vmem:[#allocation5 + $0x4] sm:$0xf]  ;;  %v319_v45 = vld [vmem:[#allocation5 + $0xc] sm:$0xf0] }
  0x16   :  { %207 = vmatpush.bf16.msra.mxu0 %v378_v16  ;;  %v318_v46 = vor.u32 %v413_v43, %v317_v42  ;;  %v43_v47 = vld [vmem:[#allocation2] sm:$0xf]  ;;  %v322_v48 = vor.u32 %v412_v44, %v319_v45  ;;  %v409_v57 = vld [vmem:[#allocation5 + $0xb0] sm:$0xf]  ;;  %v397_v59 = vld [vmem:[#allocation5 + $0x98] sm:$0xf] }
  0x17   :  { %220 = vmatpush.bf16.msra.mxu1 %v382_v17  ;;  %v44_v49 = vpack.c.bf16 %v43_v47, %v43_v47  ;;  %v435_v58 = vld [vmem:[#allocation5 + $0xb8] sm:$0xf0]  ;;  %v432_v61 = vld [vmem:[#allocation5 + $0xa0] sm:$0xf0]  ;;  %v385_v63 = vld [vmem:[#allocation5 + $0x80] sm:$0xf] }
  0x18   :  { %v410_v60 = vor.u32 %v435_v58, %v409_v57  ;;  %v398_v62 = vor.u32 %v432_v61, %v397_v59  ;;  %v429_v0 = vld [vmem:[#allocation5 + $0x88] sm:$0xf0]  ;;  %v373_v2 = vld [vmem:[#allocation5 + $0x68] sm:$0xf]  ;;  %v426_v3 = vld [vmem:[#allocation5 + $0x70] sm:$0xf0] }
  0x19   :  { %v386_v1 = vor.u32 %v429_v0, %v385_v63  ;;  %v374_v4 = vor.u32 %v426_v3, %v373_v2  ;;  %v361_v5 = vld [vmem:[#allocation5 + $0x50] sm:$0xf]  ;;  %v423_v6 = vld [vmem:[#allocation5 + $0x58] sm:$0xf0]  ;;  %v349_v8 = vld [vmem:[#allocation5 + $0x38] sm:$0xf] }
  0x1a   :  { %208 = vmatpush.bf16.msra.mxu0 %v366_v22  ;;  %231 = vmatpush.bf16.msra.mxu2 %v410_v60  ;;  %v362_v7 = vor.u32 %v423_v6, %v361_v5  ;;  %v420_v9 = vld [vmem:[#allocation5 + $0x40] sm:$0xf0]  ;;  %v337_v11 = vld [vmem:[#allocation5 + $0x20] sm:$0xf]  ;;  %v417_v12 = vld [vmem:[#allocation5 + $0x28] sm:$0xf0] }
  0x1b   :  { %221 = vmatpush.bf16.msra.mxu1 %v370_v23  ;;  %v350_v10 = vor.u32 %v420_v9, %v349_v8  ;;  %vm262_vm0 = vcmask 27648   ;;  %v338_v13 = vor.u32 %v417_v12, %v337_v11  ;;  %v325_v15 = vld [vmem:[#allocation5 + $0x8] sm:$0xf]  ;;  %v414_v16 = vld [vmem:[#allocation5 + $0x10] sm:$0xf0]  ;;  %vm279_vm1 = vcmask 1041408  }
  0x1c   :  { %v326_v18 = vor.u32 %v414_v16, %v325_v15  ;;  %vm275_vm2 = vcmask 31744   ;;  %s527_s0 = smov [#allocation7]   ;;  %s304_s23 = sshll.u32 %s556_s2, 4  ;;  %s305_s23 = int_to_ptr.hbm [resolvable:$true] %s304_s23 }
  0x1d   :  { %s302_s1 = sshll.u32 %s527_s0, 4  ;;  %s303_s1 = int_to_ptr.vmem [resolvable:$true] %s302_s1 }
  0x1e   :  { %209 = vmatpush.bf16.msra.mxu0 %v354_v28  ;;  %232 = vmatpush.bf16.msra.mxu2 %v398_v62 }
  0x1f   :  { %222 = vmatpush.bf16.msra.mxu1 %v358_v29 }
  0x22   :  { %210 = vmatpush.bf16.msra.mxu0 %v342_v34  ;;  %233 = vmatpush.bf16.msra.mxu2 %v386_v1 }
  0x23   :  { %223 = vmatpush.bf16.msra.mxu1 %v346_v35 }
  0x26   :  { %211 = vmatpush.bf16.msra.mxu0 %v330_v40  ;;  %234 = vmatpush.bf16.msra.mxu2 %v374_v4 }
  0x27   :  { %224 = vmatpush.bf16.msra.mxu1 %v334_v41 }
  0x2a   :  { %212 = vmatpush.bf16.msra.mxu0 %v318_v46  ;;  %235 = vmatpush.bf16.msra.mxu2 %v362_v7 }
  0x2b   :  { %225 = vmatpush.bf16.msra.mxu1 %v322_v48 }
  0x2d   :  { %213 = vmatmul.bf16.vlgmr.msra.gmra.mxu0 %v44_v49 }
  0x2e   :  { %226 = vmatmul.bf16.vlgmr.msra.gmra.mxu1 %v44_v49  ;;  %236 = vmatpush.bf16.msra.mxu2 %v350_v10 }
  0x32   :  { %237 = vmatpush.bf16.msra.mxu2 %v338_v13 }
  0x36   :  { %238 = vmatpush.bf16.msra.mxu2 %v326_v18 }
  0x39   :  { %239 = vmatmul.bf16.vlgmr.msra.gmra.mxu2 %v44_v49 }
  0xaa   :  { %v214_v50 = vpop.f32.mrf.mxu0 }
  0xab   :  { %v227_v51 = vpop.f32.mrf.mxu1  ;;  %v244_v53 = vmul.f32 0.0625, %v214_v50 }
  0xac   :  { %v246_v52 = vpack.c.bf16 %v227_v51, %v227_v51 }
  0xad   :  { %v245_v54 = vpack.c.bf16 %v244_v53, %v244_v53 }
  0xae   :  { %256 = vmatpush.bf16.xpose.msra.mxu3 %v246_v52 }
  0xb2   :  { %v216_v55 = vpop.f32.mrf.mxu0 }
  0xb3   :  { %v229_v56 = vpop.f32.mrf.mxu1 }
  0xb5   :  { %257 = vmatmul.bf16.vlgmr.msra.gmra.mxu3 %v245_v54 }
  0xbc   :  { %v240_v25 = vpop.f32.mrf.mxu2 }
  0xbd   :  { %v247_v26 = vmul.f32 0.25, %v240_v25 }
  0xbf   :  { %v248_v27 = vpack.c.bf16 %v247_v26, %v247_v26 }
  0xc1   :  { %v281_v28 = vsel %vm279_vm1, %v248_v27, 0 }
  0xc2   :  { %290 = vmatpush.bf16.msrb.mxu3 %v281_v28 }
  0xc4   :  { %v242_v29 = vpop.f32.mrf.mxu2 }
 0x138   :  { %v258_v14 = vpop.f32.mrf.mxu3 }
 0x139   :  { %v263_v17 = vsel %vm262_vm0, %v258_v14, -inf }
 0x13a   :  { %264 = vmax.xlane.f32.xlu0 %v263_v17 }
 0x140   :  { %v260_v19 = vpop.f32.mrf.mxu3 }
 0x1ad   :  { %v265_v20 = vpop.xlane.xlu0 %264 }
 0x1ae   :  { %v266_v21 = vsub.f32 %v258_v14, %v265_v20 }
 0x1b0   :  { %v267_v22 = vmul.f32 1.442695, %v266_v21 }
 0x1b2   :  { %441 = vpow2.f32 %v267_v22 }
 0x1b8   :  { %v442_v23 = vpop.eup %441 }
 0x1b9   :  { %v269_v24 = vsel %vm262_vm0, %v442_v23, 0.0 }
 0x1ba   :  { %270 = vadd.xlane.f32.xlu0 %v269_v24 }
 0x22d   :  { %v271_v30 = vpop.xlane.xlu0 %270 }
 0x22e   :  { %443 = vrcp.f32 %v271_v30 }
 0x234   :  { %v444_v31 = vpop.eup %443 }
 0x235   :  { %v273_v32 = vmul.f32 %v444_v31, %v442_v23 }
 0x237   :  { %v274_v33 = vpack.c.bf16 %v273_v32, %v273_v32 }
 0x239   :  { %411 = vmatmul.msk.bf16.vlgmr.msrb.gmra.mxu3 %vm275_vm2, %v274_v33 }
 0x2bc   :  { %v292_v34 = vpop.f32.mrf.mxu3 }
 0x2bd   :  { %296 = vst [vmem:[#allocation7] sm:$0xf] %v292_v34 }
 0x2be   :  { %307 = dma.vmem_to_hbm [thread:$0]  %s303_s1, 64, %s305_s23, [#allocation4]  }
 0x2c4   :  { %v294_v35 = vpop.f32.mrf.mxu3 }
 0x2c5   :  { %521 = dma.done.wait [#allocation4], 64  }
 0x2c6   :  { %522 = vsyncadd [#allocation4], 4294967232 }
 0x2c7   :  { %312 = vsyncpa [#allocation3], 1 }
 0x2c8   :  { %313 = vsyncpa [#allocation6], 1 }
 0x2c9   :  { %314 = vsyncpa [#allocation4], 1 }

</bundles_post_ra>
